<compile_context>
chip_gen: v7x
topology: tpu7x:2x2x1
jax: 0.10.0
libtpu: 0.0.40
codegen_flags: <defaults>
</compile_context>

<pallas_src>
import math
import functools

import jax
import jax.numpy as jnp
from jax import lax
from jax.experimental import pallas as pl
from jax.experimental.pallas import tpu as pltpu


# ----------------------------------------------------------------------------
# Kernel 1: linear projection  y = x @ W^T + b   (W kept in torch (d_out,d_in))
# ----------------------------------------------------------------------------
def _linear_kernel(x_ref, w_ref, b_ref, o_ref):
    # Contract x's feature dim with W's feature dim (trans-B matmul on the MXU).
    o_ref[...] = (
        lax.dot_general(
            x_ref[...], w_ref[...],
            (((1,), (1,)), ((), ())),
            preferred_element_type=jnp.float32,
        )
        + b_ref[...]
    )


def linear_pallas(x, w, b, *, block_rows=512):
    """x: (N, D_in) f32, w: (D_out, D_in) torch-layout weight, b: (D_out,)."""
    n, d_in = x.shape
    d_out = w.shape[0]
    # Row tile: whole array if small, else 512 rows (multiple of 8 for the
    # sublane rule).  Sized to stay well under the smallest scoped-VMEM default
    # (16 MiB on v5e, 32 MiB on v6e/v7x) with double-buffering; d_out is kept
    # whole since attn_dim is modest for this module.
    tm = n if n <= block_rows else block_rows
    grid = (pl.cdiv(n, tm),)
    cost = pl.CostEstimate(
        flops=2 * n * d_in * d_out,
        transcendentals=0,
        bytes_accessed=4 * (n * d_in + d_out * d_in + d_out + n * d_out),
    )
    return pl.pallas_call(
        _linear_kernel,
        out_shape=jax.ShapeDtypeStruct((n, d_out), jnp.float32),
        grid=grid,
        in_specs=[
            pl.BlockSpec((tm, d_in), lambda i: (i, 0)),
            pl.BlockSpec((d_out, d_in), lambda i: (0, 0)),   # resident weight
            pl.BlockSpec((1, d_out), lambda i: (0, 0)),      # resident bias
        ],
        out_specs=pl.BlockSpec((tm, d_out), lambda i: (i, 0)),
        compiler_params=pltpu.CompilerParams(dimension_semantics=("parallel",)),
        cost_estimate=cost,
    )(x, w, b[None, :])


# ----------------------------------------------------------------------------
# Kernel 2: low-rank cross attention core, one batch element per grid step,
#           all a_h head-groups processed with batched einsums.
# ----------------------------------------------------------------------------
def _cross_attn_kernel(q_ref, k_ref, v_ref, f_ref, o_ref, *, scale):
    q = q_ref[...]   # (a_h, Lq_r, HR)   -- Q already transposed in the wrapper
    k = k_ref[...]   # (a_h, HR, k_r)
    v = v_ref[...]   # (a_h, HR, k_r)
    f = f_ref[...]   # (a_h, k_r, rank)

    # 1/sqrt(HR) folded into the (tiny) factor once for the K path.
    kf = jnp.einsum("ahk,akr->ahr", k, f * scale,
                    preferred_element_type=jnp.float32)        # (a_h, HR, rank)
    vf = jnp.einsum("ahk,akr->ahr", v, f,
                    preferred_element_type=jnp.float32)        # (a_h, HR, rank)

    # scores = (Q^T Kf) / sqrt(HR)  -> (a_h, Lq_r, rank)
    s = jnp.einsum("aqh,ahr->aqr", q, kf,
                   preferred_element_type=jnp.float32)
    s = s - jnp.max(s, axis=-1, keepdims=True)
    e = jnp.exp(s)
    denom = jnp.sum(e, axis=-1, keepdims=True)
    attn = e * pl.reciprocal(denom, approx=True)               # EUP slot, ~free

    # attn @ Vf^T  -> (a_h, Lq_r, HR)
    o_ref[...] = jnp.einsum("aqr,ahr->aqh", attn, vf,
                            preferred_element_type=jnp.float32)


def cross_attention_pallas(Qt, Kr, Vr, factor, scale):
    """Qt: (bs, a_h, Lq_r, HR), Kr/Vr: (bs, a_h, HR, k_r), factor: (a_h, k_r, rank)."""
    bs, a_h, Lq_r, HR = Qt.shape
    k_r = Kr.shape[-1]
    rank = factor.shape[-1]
    kernel = functools.partial(_cross_attn_kernel, scale=scale)
    out_size = bs * a_h * Lq_r * HR
    cost = pl.CostEstimate(
        flops=2 * bs * a_h * (2 * HR * k_r * rank + 2 * Lq_r * HR * rank),
        transcendentals=bs * a_h * Lq_r * rank,
        bytes_accessed=4 * (Qt.size + Kr.size + Vr.size + factor.size + out_size),
    )
    return pl.pallas_call(
        kernel,
        out_shape=jax.ShapeDtypeStruct((bs, a_h, Lq_r, HR), jnp.float32),
        grid=(bs,),
        in_specs=[
            pl.BlockSpec((None, a_h, Lq_r, HR), lambda b: (b, 0, 0, 0)),
            pl.BlockSpec((None, a_h, HR, k_r), lambda b: (b, 0, 0, 0)),
            pl.BlockSpec((None, a_h, HR, k_r), lambda b: (b, 0, 0, 0)),
            pl.BlockSpec((a_h, k_r, rank), lambda b: (0, 0, 0)),   # resident
        ],
        out_specs=pl.BlockSpec((None, a_h, Lq_r, HR), lambda b: (b, 0, 0, 0)),
        compiler_params=pltpu.CompilerParams(dimension_semantics=("parallel",)),
        cost_estimate=cost,
    )(Qt, Kr, Vr, factor)


# ----------------------------------------------------------------------------
# Forward pass (glue reshapes are metadata-only bitcasts, matching torch .view)
# ----------------------------------------------------------------------------
def multihead_cross_attention(Q, K, V, params, *, attn_dim, K_dim, head, rank):
    a_h = attn_dim // head
    k_r = K_dim // rank
    HR = head * rank
    bs, Lq, _ = Q.shape

    Qp = linear_pallas(Q.reshape(-1, attn_dim), params["WQ"], params["bQ"])
    Kp = linear_pallas(K.reshape(-1, attn_dim), params["WK"], params["bK"])
    Vp = linear_pallas(V.reshape(-1, attn_dim), params["WV"], params["bV"])

    # torch .view(bs, a_h, head*rank, -1) == flat row-major reshape (free)
    Lq_r = (Lq * attn_dim) // (a_h * HR)   # == Lq // rank
    Qr = Qp.reshape(bs, a_h, HR, Lq_r)
    Kr = Kp.reshape(bs, a_h, HR, k_r)
    Vr = Vp.reshape(bs, a_h, HR, k_r)

    # Present Q with HR on the lane (last) axis so every in-kernel matmul is a
    # standard / trans-B batched contraction (no per-step XLU transpose).
    Qt = jnp.swapaxes(Qr, -1, -2)          # (bs, a_h, Lq_r, HR)

    scale = 1.0 / math.sqrt(HR)
    out = cross_attention_pallas(Qt, Kr, Vr, params["factor"][0], scale)
    # torch .view(bs, -1, attn_dim) -- flat reshape (free bitcast)
    return out.reshape(bs, -1, attn_dim)


# ----------------------------------------------------------------------------
# Pure-JAX reference (mirrors the PyTorch math) for a correctness check
# ----------------------------------------------------------------------------
def reference(Q, K, V, params, attn_dim, K_dim, head, rank):
    a_h = attn_dim // head
    k_r = K_dim // rank
    HR = head * rank
    bs = Q.shape[0]
    Qp = Q @ params["WQ"].T + params["bQ"]
    Kp = K @ params["WK"].T + params["bK"]
    Vp = V @ params["WV"].T + params["bV"]
    Qr = Qp.reshape(bs, a_h, HR, -1)
    Kr = Kp.reshape(bs, a_h, HR, k_r) @ params["factor"]
    Vr = Vp.reshape(bs, a_h, HR, k_r) @ params["factor"]
    scores = jnp.swapaxes(Qr, -2, -1) @ Kr / math.sqrt(HR)
    attn = jax.nn.softmax(scores, axis=-1)
    out = attn @ jnp.swapaxes(Vr, -2, -1)
    return out.reshape(bs, -1, attn_dim)


if __name__ == "__main__":
    # Small shapes consistent with the module's constraints:
    #   attn_dim % head == 0, K_dim % rank == 0, seq(K) == K_dim, seq(Q) % rank == 0
    bs, attn_dim, K_dim, head, rank = 2, 32, 16, 4, 4
    L_q = 16
    a_h = attn_dim // head
    k_r = K_dim // rank

    key = jax.random.PRNGKey(0)
    ks = jax.random.split(key, 10)

    def lin_init(kw, kb, fan_in, fan_out):
        bound = 1.0 / math.sqrt(fan_in)
        W = jax.random.uniform(
            kw, (fan_out, fan_in), minval=-bound, maxval=bound, dtype=jnp.float32
        )
        b = jax.random.uniform(
            kb, (fan_out,), minval=-bound, maxval=bound, dtype=jnp.float32
        )
        return W, b

    WQ, bQ = lin_init(ks[0], ks[1], attn_dim, attn_dim)
    WK, bK = lin_init(ks[2], ks[3], attn_dim, attn_dim)
    WV, bV = lin_init(ks[4], ks[5], attn_dim, attn_dim)

    # xavier_normal_ on factor of shape (1, a_h, k_r, rank)
    fan_in = a_h * k_r * rank
    fan_out = 1 * k_r * rank
    std = math.sqrt(2.0 / (fan_in + fan_out))
    factor = std * jax.random.normal(ks[6], (1, a_h, k_r, rank), dtype=jnp.float32)

    params = dict(WQ=WQ, bQ=bQ, WK=WK, bK=bK, WV=WV, bV=bV, factor=factor)

    Q = jax.random.normal(ks[7], (bs, L_q, attn_dim), dtype=jnp.float32)
    K = jax.random.normal(ks[8], (bs, K_dim, attn_dim), dtype=jnp.float32)
    V = jax.random.normal(ks[9], (bs, K_dim, attn_dim), dtype=jnp.float32)

    out = multihead_cross_attention(
        Q, K, V, params, attn_dim=attn_dim, K_dim=K_dim, head=head, rank=rank
    )
    out = jax.block_until_ready(out)

    ref = reference(Q, K, V, params, attn_dim, K_dim, head, rank)
    assert out.shape == (bs, L_q, attn_dim), out.shape
    # Tolerance loosened slightly vs. the exact f32 reference because the
    # softmax normalization uses the EUP approximate reciprocal.
    assert jnp.allclose(out, ref, atol=2e-2, rtol=2e-2), float(
        jnp.max(jnp.abs(out - ref))
    )
    print("KERNEL_OK")
</pallas_src>

<mosaic_0001>
module attributes {stable_mosaic.version = 11 : i64} {
  func.func @_linear_kernel(%arg0: i32, %arg1: memref<32x32xf32, #tpu.memory_space<vmem>>, %arg2: memref<32x32xf32, #tpu.memory_space<vmem>>, %arg3: memref<1x32xf32, #tpu.memory_space<vmem>>, %arg4: memref<32x32xf32, #tpu.memory_space<vmem>>) attributes {dimension_semantics = [#tpu.dimension_semantics<parallel>], iteration_bounds = array<i64: 1>, scalar_prefetch = 0 : i64, scratch_operands = 0 : i64, tpu.core_type = #tpu.core_type<tc>, window_params = [{transform_indices = @transform_0, window_bounds = array<i64: 32, 32>}, {pipeline_mode = #tpu.pipeline_mode<synchronous>, transform_indices = @transform_1, window_bounds = array<i64: 32, 32>}, {pipeline_mode = #tpu.pipeline_mode<synchronous>, transform_indices = @transform_2, window_bounds = array<i64: 1, 32>}, {transform_indices = @transform_3, window_bounds = array<i64: 32, 32>}]} {
    %c0 = arith.constant 0 : index
    %c0_0 = arith.constant 0 : index
    %0 = vector.load %arg1[%c0, %c0_0] : memref<32x32xf32, #tpu.memory_space<vmem>>, vector<32x32xf32>
    %c0_1 = arith.constant 0 : index
    %c0_2 = arith.constant 0 : index
    %1 = vector.load %arg2[%c0_1, %c0_2] : memref<32x32xf32, #tpu.memory_space<vmem>>, vector<32x32xf32>
    %cst = arith.constant dense<0.000000e+00> : vector<32x32xf32>
    %2 = tpu.matmul %0, %1, %cst {dimension_numbers = #tpu.dot_dimension_numbers<[1], [1], [0], [0], [0, 0, 1, 0], [], []>} : vector<32x32xf32>, vector<32x32xf32>, vector<32x32xf32> -> vector<32x32xf32>
    %c0_3 = arith.constant 0 : index
    %c0_4 = arith.constant 0 : index
    %3 = vector.load %arg3[%c0_3, %c0_4] : memref<1x32xf32, #tpu.memory_space<vmem>>, vector<1x32xf32>
    %4 = vector.broadcast %3 : vector<1x32xf32> to vector<32x32xf32>
    %5 = arith.addf %2, %4 : vector<32x32xf32>
    %c0_5 = arith.constant 0 : index
    %c0_6 = arith.constant 0 : index
    %6 = vector.load %arg4[%c0_5, %c0_6] : memref<32x32xf32, #tpu.memory_space<vmem>>, vector<32x32xf32>
    tpu.vector_store %arg4[%c0_5, %c0_6], %5 {strides = array<i32>} : memref<32x32xf32, #tpu.memory_space<vmem>>, vector<32x32xf32>,
    return
  }
  func.func @transform_0(%arg0: i32) -> (i32, i32) {
    %c0_i32 = arith.constant 0 : i32
    %c0_i32_0 = arith.constant 0 : i32
    return %arg0, %c0_i32 : i32, i32
  }
  func.func @transform_1(%arg0: i32) -> (i32, i32) {
    %c0_i32 = arith.constant 0 : i32
    %c0_i32_0 = arith.constant 0 : i32
    %c0_i32_1 = arith.constant 0 : i32
    return %c0_i32, %c0_i32_0 : i32, i32
  }
  func.func @transform_2(%arg0: i32) -> (i32, i32) {
    %c0_i32 = arith.constant 0 : i32
    %c0_i32_0 = arith.constant 0 : i32
    %c0_i32_1 = arith.constant 0 : i32
    return %c0_i32, %c0_i32_0 : i32, i32
  }
  func.func @transform_3(%arg0: i32) -> (i32, i32) {
    %c0_i32 = arith.constant 0 : i32
    %c0_i32_0 = arith.constant 0 : i32
    return %arg0, %c0_i32 : i32, i32
  }
}

</mosaic_0001>

<bundles_post_ra>
// kernel: tpu_custom_call.1
= control target key start
LH: loop header
LB: loop body
LE: loop exit
PB: predicated region body
PF: predicated region fallthrough
CT: control target
= control target key end

     0   :  { %8 = vsyncpa [#allocation3], 0  ;;  %s417_s0 = inlined_call_operand.hbm [shape: f32[32,32], index: 0, kind: input, shape index: {}]   ;;  %s418_s1 = inlined_call_operand.hbm [shape: f32[32,32], index: 1, kind: input, shape index: {}]   ;;  %s419_s2 = inlined_call_operand.vmem [shape: f32[1,32], index: 2, kind: input, shape index: {}]   ;;  %s420_s3 = inlined_call_operand.hbm [shape: f32[32,32], index: 3, kind: output, shape index: {}]  }
   0x1   :  { %9 = vsyncpa [#allocation6], 0 }
   0x2   :  { %10 = vsyncpa [#allocation4], 0  ;;  %s314_s12 = smov [#allocation2]   ;;  %s242_s16 = scalar_lea.hbm %s417_s0, 512 }
   0x3   :  { %s16_s13 = sshll.u32 %s314_s12, 4  ;;  %p243_p0 = scmp.ne.s32.totalorder %s417_s0, %s242_s16  ;;  %s17_s13 = int_to_ptr.vmem [resolvable:$true] %s16_s13 }
   0x4   :  { %p246_p1 = scmp.lt.u32.totalorder %s242_s16, %s417_s0 }
   0x6   :  { %p248_p2 = pnand %p246_p1, %p243_p0 }
   0x8   :  { %251 = shalt.err (!%p248_p2)
}
   0x9   :  { %s252_s21 = scalar_lea.vmem %s17_s13, 512  ;;  %p257_p4 = scmp.lt.s32.totalorder %s17_s13, %s17_s13 }
   0xa   :  { %p253_p3 = scmp.ne.s32.totalorder %s17_s13, %s252_s21  ;;  %p258_p5 = scmp.lt.s32.totalorder %s252_s21, %s252_s21 }
   0xc   :  { %p259_p6 = por %p258_p5, %p257_p4 }
   0xe   :  { %p260_p7 = pnand %p259_p6, %p253_p3 }
  0x10   :  { %263 = shalt.err (!%p260_p7)
}
  0x11   :  { %s315_s22 = smov 128   ;;  %s316_s23 = smov 8  }
  0x12   :  { %22 = dma.hbm_to_vmem [thread:$0]  %s417_s0, 512, %s17_s13, [#allocation3], %s315_s22, %s315_s22, %s316_s23  }
  0x13   :  { %s317_s26 = smov [#allocation5]   ;;  %s264_s30 = scalar_lea.hbm %s418_s1, 512 }
  0x14   :  { %s28_s27 = sshll.u32 %s317_s26, 4  ;;  %p265_p8 = scmp.ne.s32.totalorder %s418_s1, %s264_s30  ;;  %s29_s27 = int_to_ptr.vmem [resolvable:$true] %s28_s27 }
  0x15   :  { %p268_p9 = scmp.lt.u32.totalorder %s264_s30, %s418_s1 }
  0x17   :  { %p270_p10 = pnand %p268_p9, %p265_p8 }
  0x19   :  { %273 = shalt.err (!%p270_p10)
}
  0x1a   :  { %s274_s8 = scalar_lea.vmem %s29_s27, 512  ;;  %p279_p12 = scmp.lt.s32.totalorder %s29_s27, %s29_s27 }
  0x1b   :  { %p275_p11 = scmp.ne.s32.totalorder %s29_s27, %s274_s8  ;;  %p280_p13 = scmp.lt.s32.totalorder %s274_s8, %s274_s8 }
  0x1d   :  { %p281_p0 = por %p280_p13, %p279_p12 }
  0x1f   :  { %p282_p1 = pnand %p281_p0, %p275_p11 }
  0x21   :  { %285 = shalt.err (!%p282_p1)
}
  0x22   :  { %34 = dma.hbm_to_vmem [thread:$0]  %s418_s1, 512, %s29_s27, [#allocation6], %s315_s22, %s315_s22, %s316_s23  }
  0x23   :  { %308 = dma.done.wait [#allocation3], 512  }
  0x24   :  { %309 = vsyncadd [#allocation3], 4294966784 }
  0x25   :  { %310 = dma.done.wait [#allocation6], 512  }
  0x26   :  { %311 = vsyncadd [#allocation6], 4294966784  ;;  %vm58_vm0 = vcmask 261120   ;;  %v47_v1 = vld [vmem:[#allocation5] sm:$0xff]  ;;  %v48_v2 = vld [vmem:[#allocation5 + $0x8] sm:$0xff]  ;;  %s318_s11 = smov [#allocation7]  }
  0x27   :  { %vm371_vm1 = vmpackc.low %vm58_vm0, %vm58_vm0  ;;  %v49_v3 = vld [vmem:[#allocation5 + $0x10] sm:$0xff]  ;;  %v221_v4 = vpack.c.bf16 %v48_v2, %v47_v1  ;;  %v50_v5 = vld [vmem:[#allocation5 + $0x18] sm:$0xff]  ;;  %s177_s12 = sshll.u32 %s318_s11, 4  ;;  %s178_s12 = int_to_ptr.vmem [resolvable:$true] %s177_s12 }
  0x28   :  { %v43_v6 = vld [vmem:[#allocation2] sm:$0xff]  ;;  %v45_v7 = vld [vmem:[#allocation2 + $0x10] sm:$0xff]  ;;  %v227_v8 = vpack.c.bf16 %v50_v5, %v49_v3  ;;  %v44_v9 = vld [vmem:[#allocation2 + $0x8] sm:$0xff]  ;;  %p291_p3 = scmp.lt.s32.totalorder %s178_s12, %s178_s12 }
  0x29   :  { %215 = vmatprep.mubr.msk.f32.mxu0 %vm58_vm0, %v43_v6  ;;  %218 = vmatprep.mubr.msk.f32.mxu1 %vm58_vm0, %v45_v7  ;;  %v46_v10 = vld [vmem:[#allocation2 + $0x18] sm:$0xff]  ;;  %v190_v11 = vld [vmem:[%s419_s2] ss:$0 sm:$0xff]  ;;  %s286_s2 = scalar_lea.vmem %s178_s12, 512 }
  0x2a   :  { %223 = vmatprep.subr.msk.bf16.mxu0 %vm371_vm1, %v221_v4  ;;  %233 = vmatprep.subr.msk.bf16.mxu1 %vm371_vm1, %v221_v4  ;;  %p287_p2 = scmp.ne.s32.totalorder %s178_s12, %s286_s2  ;;  %p292_p4 = scmp.lt.s32.totalorder %s286_s2, %s286_s2 }
  0x2b   :  { %226 = vmatpush3.bf16.xpose.msk.msra.mxu0 %vm371_vm1, %v221_v4  ;;  %235 = vmatpush3.bf16.xpose.msk.msra.mxu1 %vm371_vm1, %v221_v4 }
  0x2c   :  { %229 = vmatprep.subr.msk.bf16.mxu0 %vm371_vm1, %v227_v8  ;;  %234 = vmatprep.subr.msk.bf16.mxu1 %vm371_vm1, %v227_v8  ;;  %p293_p5 = por %p292_p4, %p291_p3 }
  0x2e   :  { %p294_p6 = pnand %p293_p5, %p287_p2 }
  0x33   :  { %232 = vmatpush3.bf16.xpose.msk.msra.mxu0 %vm371_vm1, %v227_v8  ;;  %236 = vmatpush3.bf16.xpose.msk.msra.mxu1 %vm371_vm1, %v227_v8 }
  0x3a   :  { %216 = vmatmul.mubr.msk.f32.vlgmr.msra.gmra.mrb[0].mxu0 %vm58_vm0, %v44_v9  ;;  %219 = vmatmul.mubr.msk.f32.vlgmr.msra.gmra.mrb[0].mxu1 %vm58_vm0, %v46_v10 }
 0x10d   :  { %v217_v12 = vpop.f32.mrb[0].mxu0  ;;  %v220_v13 = vpop.f32.mrb[0].mxu1 }
 0x10e   :  { %v155_v14 = vadd.f32 %v217_v12, %v190_v11  ;;  %v165_v15 = vadd.f32 %v220_v13, %v190_v11  ;;  %v149_v16 = vpop.f32.mrb[1].mxu0  ;;  %v159_v17 = vpop.f32.mrb[1].mxu1 }
 0x10f   :  { %v150_v18 = vadd.f32 %v190_v11, %v149_v16  ;;  %v160_v19 = vadd.f32 %v190_v11, %v159_v17 }
 0x110   :  { %169 = vst.msk [vmem:[#allocation7 + $0x8] sm:$0xff] %vm58_vm0, %v155_v14  ;;  %171 = vst.msk [vmem:[#allocation7 + $0x18] sm:$0xff] %vm58_vm0, %v165_v15 }
 0x111   :  { %168 = vst.msk [vmem:[#allocation7] sm:$0xff] %vm58_vm0, %v150_v18  ;;  %170 = vst.msk [vmem:[#allocation7 + $0x10] sm:$0xff] %vm58_vm0, %v160_v19 }
 0x112   :  { %297 = shalt.err (!%p294_p6)
}
 0x113   :  { %s298_s15 = scalar_lea.hbm %s420_s3, 512 }
 0x114   :  { %p299_p7 = scmp.ne.s32.totalorder %s420_s3, %s298_s15  ;;  %p302_p8 = scmp.lt.u32.totalorder %s298_s15, %s420_s3 }
 0x116   :  { %p304_p9 = pnand %p302_p8, %p299_p7 }
 0x118   :  { %307 = shalt.err (!%p304_p9)
}
 0x119   :  { %183 = dma.vmem_to_hbm [thread:$0]  %s178_s12, 512, %s420_s3, [#allocation4], %s315_s22, %s315_s22, %s316_s23  }
 0x11a   :  { %312 = dma.done.wait [#allocation4], 512  }
 0x11b   :  { %313 = vsyncadd [#allocation4], 4294966784 }
 0x11c   :  { %187 = vsyncpa [#allocation3], 1 }
 0x11d   :  { %188 = vsyncpa [#allocation6], 1 }
 0x11e   :  { %189 = vsyncpa [#allocation4], 1 }

</bundles_post_ra>
